<compile_context>
chip_gen: v7x
topology: tpu7x:2x2x1
jax: 0.10.0
libtpu: 0.0.40
codegen_flags: <defaults>
</compile_context>

<pallas_src>
from functools import partial

import jax
import jax.numpy as jnp
from jax.experimental import pallas as pl
from jax.experimental.pallas import tpu as pltpu

INPUT_SIZE = 3
HIDDEN_SIZE = 60
LATENT_SIZE = 2


def _autoencoder_kernel(x_ref,
                        a1_ref, c1_ref,
                        amid_ref, cmid_ref,
                        a3_ref, c3_ref,
                        o_ref):
    # Feature-major tiles: (features, TB) with the batch tile on the lane axis.
    x = x_ref[...]                                                 # (IN, TB) f32
    a1 = a1_ref[...]                                               # (HID, IN) f32

    # encoder.fc1 + relu on the VPU: K=3 is a terrible MXU fill, so compute
    # h = W1 @ x as 3 broadcast multiply-adds instead of a (60,3)@(3,TB) dot.
    h = (a1[:, 0:1] * x[0:1, :]
         + a1[:, 1:2] * x[1:2, :]
         + a1[:, 2:3] * x[2:3, :])                                 # (HID, TB) f32
    h = jnp.maximum(h + c1_ref[...], 0.0)

    # encoder.fc2 -> decoder.fc1 + relu, folded into one (HID, HID) MXU matmul.
    # bf16 operands, f32 accumulation (avoids multi-pass f32 MXU emulation).
    g = jnp.dot(amid_ref[...], h.astype(jnp.bfloat16),
                preferred_element_type=jnp.float32) + cmid_ref[...]
    g = jnp.maximum(g, 0.0)                                        # (HID, TB) f32

    # decoder.fc2 : (IN, HID) @ (HID, TB) + (IN, 1), bf16 operands on the MXU.
    y = jnp.dot(a3_ref[...], g.astype(jnp.bfloat16),
                preferred_element_type=jnp.float32) + c3_ref[...]
    o_ref[...] = y.astype(o_ref.dtype)


@partial(jax.jit, static_argnames=("tile_b",))
def autoencoder_forward(x, params, *, tile_b=8192):
    """x: (B, INPUT_SIZE) float32. params: weights as (in, out), biases (1, out).

    tile_b guidance: 8192-32768 amortizes grid-step overhead (each step moves
    only 24*tile_b bytes of x/out).  Cap at ~32768 on v7x (64 MiB physical
    VMEM per TC).  vmem_limit_bytes below is derived from the tile so the
    larger tiles also clear v5e's 16 MiB scoped-VMEM default.
    """
    B = x.shape[0]
    # Lane tile must be a multiple of 128; never over-pad a tiny batch.
    tile_b = max(128, (tile_b // 128) * 128)
    tile = min(tile_b, pl.cdiv(B, 128) * 128)
    b_pad = pl.cdiv(B, tile) * tile
    grid_b = b_pad // tile

    # Feature-major input, zero-padded on the batch (lane) axis.  Inside jit
    # these layout passes fuse with neighbors instead of being standalone
    # HBM round-trips.
    x_fm = jnp.pad(x.astype(jnp.float32).T, ((0, 0), (0, b_pad - B)))

    # Kernel operands, feature-major / PyTorch (out, in) orientation.
    # The bottleneck fold:  relu((h@We2+be2)@Wd1+bd1)
    #                    == relu(h@(We2@Wd1) + (be2@Wd1+bd1)).
    a1 = params["w_e1"].T.astype(jnp.float32)                      # (HID, IN)  f32
    c1 = params["b_e1"].T.astype(jnp.float32)                      # (HID, 1)   f32
    w_mid = params["w_e2"] @ params["w_d1"]                        # (HID, HID) (in,out)
    b_mid = params["b_e2"] @ params["w_d1"] + params["b_d1"]       # (1, HID)
    amid = w_mid.T.astype(jnp.bfloat16)                            # (HID, HID) bf16
    cmid = b_mid.T.astype(jnp.float32)                             # (HID, 1)   f32
    a3 = params["w_d2"].T.astype(jnp.bfloat16)                     # (IN, HID)  bf16
    c3 = params["b_d2"].T.astype(jnp.float32)                      # (IN, 1)    f32

    def const_spec(arr):
        # Whole-array block, same block every grid step -> fetched once,
        # stays VMEM-resident.
        return pl.BlockSpec(arr.shape, lambda i: (0, 0))

    # Per-step VMEM: x/out double buffers + f32 h/g intermediates + bf16 casts
    # + weights.  Ask for headroom so big tiles clear v5e's 16 MiB default.
    vmem_est = (2 * 2 * INPUT_SIZE * tile * 4        # x + out, double-buffered f32
                + 2 * HIDDEN_SIZE * tile * 4         # h, g f32
                + 2 * HIDDEN_SIZE * tile * 2         # bf16 casts of h, g
                + (1 << 20))                         # weights/biases + slack
    vmem_limit = int(min(128 * 1024 * 1024, max(32 * 1024 * 1024, 2 * vmem_est)))

    out_fm = pl.pallas_call(
        _autoencoder_kernel,
        out_shape=jax.ShapeDtypeStruct((INPUT_SIZE, b_pad), jnp.float32),
        grid=(grid_b,),
        in_specs=[
            pl.BlockSpec((INPUT_SIZE, tile), lambda i: (0, i)),    # x tile
            const_spec(a1), const_spec(c1),
            const_spec(amid), const_spec(cmid),
            const_spec(a3), const_spec(c3),
        ],
        out_specs=pl.BlockSpec((INPUT_SIZE, tile), lambda i: (0, i)),
        compiler_params=pltpu.CompilerParams(
            dimension_semantics=("parallel",),
            vmem_limit_bytes=vmem_limit),
    )(x_fm, a1, c1, amid, cmid, a3, c3)

    # Back to the PyTorch-facing (B, INPUT_SIZE) layout, dropping batch padding.
    return out_fm[:, :B].T


def init_params(key):
    """Deterministic synthetic init. Weights stored as (in, out), biases (1, out)."""
    ks = jax.random.split(key, 8)

    def lin(kw, kb, n_in, n_out):
        bound = 1.0 / jnp.sqrt(jnp.float32(n_in))
        w = jax.random.uniform(kw, (n_in, n_out), jnp.float32, -bound, bound)
        b = jax.random.uniform(kb, (1, n_out), jnp.float32, -bound, bound)
        return w, b

    w_e1, b_e1 = lin(ks[0], ks[1], INPUT_SIZE, HIDDEN_SIZE)
    w_e2, b_e2 = lin(ks[2], ks[3], HIDDEN_SIZE, LATENT_SIZE)
    w_d1, b_d1 = lin(ks[4], ks[5], LATENT_SIZE, HIDDEN_SIZE)
    w_d2, b_d2 = lin(ks[6], ks[7], HIDDEN_SIZE, INPUT_SIZE)
    return {
        "w_e1": w_e1, "b_e1": b_e1,
        "w_e2": w_e2, "b_e2": b_e2,
        "w_d1": w_d1, "b_d1": b_d1,
        "w_d2": w_d2, "b_d2": b_d2,
    }


def reference_forward(x, p):
    """Unfused, batch-major f32 reference matching the PyTorch module exactly."""
    h = jnp.maximum(x @ p["w_e1"] + p["b_e1"], 0.0)
    z = h @ p["w_e2"] + p["b_e2"]
    g = jnp.maximum(z @ p["w_d1"] + p["b_d1"], 0.0)
    return g @ p["w_d2"] + p["b_d2"]


def reference_forward_bf16(x, p):
    """Reference reproducing the kernel's folding + bf16 operand casts."""
    bf = jnp.bfloat16
    h = jnp.maximum(x @ p["w_e1"] + p["b_e1"], 0.0)
    w_mid = p["w_e2"] @ p["w_d1"]
    b_mid = p["b_e2"] @ p["w_d1"] + p["b_d1"]
    g = jnp.maximum(
        jnp.dot(h.astype(bf), w_mid.astype(bf),
                preferred_element_type=jnp.float32) + b_mid, 0.0)
    return jnp.dot(g.astype(bf), p["w_d2"].astype(bf),
                   preferred_element_type=jnp.float32) + p["b_d2"]


if __name__ == "__main__":
    key = jax.random.PRNGKey(0)
    k_x, k_p = jax.random.split(key)

    # Small test shapes: B=300 with a 256-wide tile exercises batch padding
    # and a 2-step grid (both TensorCores on v7x).  Production default is 8192.
    B = 300
    x = jax.random.normal(k_x, (B, INPUT_SIZE), jnp.float32)
    params = init_params(k_p)

    out = autoencoder_forward(x, params, tile_b=256)
    out = jax.block_until_ready(out)
    assert out.shape == (B, INPUT_SIZE)

    # Tight check vs a reference doing the same bf16 casts (kernel mechanics).
    ref_bf16 = reference_forward_bf16(x, params)
    err_bf16 = float(jnp.max(jnp.abs(out - ref_bf16)))
    assert err_bf16 < 2e-3, err_bf16

    # Loose check vs the exact f32 PyTorch-equivalent forward (semantics);
    # bf16 matmul operands make 1e-4 too tight, per the review.
    ref = reference_forward(x, params)
    err = float(jnp.max(jnp.abs(out - ref)))
    assert err < 1e-1, err

    print("KERNEL_OK")
</pallas_src>

<mosaic_0001>
module attributes {stable_mosaic.version = 11 : i64} {
  func.func @_autoencoder_kernel(%arg0: i32, %arg1: memref<3x256xf32, #tpu.memory_space<vmem>>, %arg2: memref<60x3xf32, #tpu.memory_space<vmem>>, %arg3: memref<60x1xf32, #tpu.memory_space<vmem>>, %arg4: memref<60x60xbf16, #tpu.memory_space<vmem>>, %arg5: memref<60x1xf32, #tpu.memory_space<vmem>>, %arg6: memref<3x60xbf16, #tpu.memory_space<vmem>>, %arg7: memref<3x1xf32, #tpu.memory_space<vmem>>, %arg8: memref<3x256xf32, #tpu.memory_space<vmem>>) attributes {dimension_semantics = [#tpu.dimension_semantics<parallel>], iteration_bounds = array<i64: 2>, scalar_prefetch = 0 : i64, scratch_operands = 0 : i64, tpu.core_type = #tpu.core_type<tc>, window_params = [{transform_indices = @transform_0, window_bounds = array<i64: 3, 256>}, {pipeline_mode = #tpu.pipeline_mode<synchronous>, transform_indices = @transform_1, window_bounds = array<i64: 60, 3>}, {pipeline_mode = #tpu.pipeline_mode<synchronous>, transform_indices = @transform_2, window_bounds = array<i64: 60, 1>}, {pipeline_mode = #tpu.pipeline_mode<synchronous>, transform_indices = @transform_3, window_bounds = array<i64: 60, 60>}, {pipeline_mode = #tpu.pipeline_mode<synchronous>, transform_indices = @transform_4, window_bounds = array<i64: 60, 1>}, {pipeline_mode = #tpu.pipeline_mode<synchronous>, transform_indices = @transform_5, window_bounds = array<i64: 3, 60>}, {pipeline_mode = #tpu.pipeline_mode<synchronous>, transform_indices = @transform_6, window_bounds = array<i64: 3, 1>}, {transform_indices = @transform_7, window_bounds = array<i64: 3, 256>}]} {
    %c0 = arith.constant 0 : index
    %c0_0 = arith.constant 0 : index
    %0 = vector.load %arg1[%c0, %c0_0] : memref<3x256xf32, #tpu.memory_space<vmem>>, vector<3x256xf32>
    %c0_1 = arith.constant 0 : index
    %c0_2 = arith.constant 0 : index
    %1 = vector.load %arg2[%c0_1, %c0_2] : memref<60x3xf32, #tpu.memory_space<vmem>>, vector<60x3xf32>
    %2 = vector.extract_strided_slice %1 {offsets = [0, 0], sizes = [60, 1], strides = [1, 1]} : vector<60x3xf32> to vector<60x1xf32>
    %3 = vector.extract_strided_slice %0 {offsets = [0, 0], sizes = [1, 256], strides = [1, 1]} : vector<3x256xf32> to vector<1x256xf32>
    %4 = vector.broadcast %2 : vector<60x1xf32> to vector<60x256xf32>
    %5 = vector.broadcast %3 : vector<1x256xf32> to vector<60x256xf32>
    %6 = arith.mulf %4, %5 : vector<60x256xf32>
    %7 = vector.extract_strided_slice %1 {offsets = [0, 1], sizes = [60, 1], strides = [1, 1]} : vector<60x3xf32> to vector<60x1xf32>
    %8 = vector.extract_strided_slice %0 {offsets = [1, 0], sizes = [1, 256], strides = [1, 1]} : vector<3x256xf32> to vector<1x256xf32>
    %9 = vector.broadcast %7 : vector<60x1xf32> to vector<60x256xf32>
    %10 = vector.broadcast %8 : vector<1x256xf32> to vector<60x256xf32>
    %11 = arith.mulf %9, %10 : vector<60x256xf32>
    %12 = arith.addf %6, %11 : vector<60x256xf32>
    %13 = vector.extract_strided_slice %1 {offsets = [0, 2], sizes = [60, 1], strides = [1, 1]} : vector<60x3xf32> to vector<60x1xf32>
    %14 = vector.extract_strided_slice %0 {offsets = [2, 0], sizes = [1, 256], strides = [1, 1]} : vector<3x256xf32> to vector<1x256xf32>
    %15 = vector.broadcast %13 : vector<60x1xf32> to vector<60x256xf32>
    %16 = vector.broadcast %14 : vector<1x256xf32> to vector<60x256xf32>
    %17 = arith.mulf %15, %16 : vector<60x256xf32>
    %18 = arith.addf %12, %17 : vector<60x256xf32>
    %c0_3 = arith.constant 0 : index
    %c0_4 = arith.constant 0 : index
    %19 = vector.load %arg3[%c0_3, %c0_4] : memref<60x1xf32, #tpu.memory_space<vmem>>, vector<60x1xf32>
    %20 = vector.broadcast %19 : vector<60x1xf32> to vector<60x256xf32>
    %21 = arith.addf %18, %20 : vector<60x256xf32>
    %cst = arith.constant 0.000000e+00 : f32
    %22 = vector.broadcast %cst : f32 to vector<60x256xf32>
    %23 = arith.maximumf %21, %22 : vector<60x256xf32>
    %c0_5 = arith.constant 0 : index
    %c0_6 = arith.constant 0 : index
    %24 = vector.load %arg4[%c0_5, %c0_6] : memref<60x60xbf16, #tpu.memory_space<vmem>>, vector<60x60xbf16>
    %25 = arith.truncf %23 : vector<60x256xf32> to vector<60x256xbf16>
    %cst_7 = arith.constant dense<0.000000e+00> : vector<60x256xf32>
    %26 = tpu.matmul %24, %25, %cst_7 {dimension_numbers = #tpu.dot_dimension_numbers<[1], [0], [0], [1], [0, 0, 1, 1], [], []>} : vector<60x60xbf16>, vector<60x256xbf16>, vector<60x256xf32> -> vector<60x256xf32>
    %c0_8 = arith.constant 0 : index
    %c0_9 = arith.constant 0 : index
    %27 = vector.load %arg5[%c0_8, %c0_9] : memref<60x1xf32, #tpu.memory_space<vmem>>, vector<60x1xf32>
    %28 = vector.broadcast %27 : vector<60x1xf32> to vector<60x256xf32>
    %29 = arith.addf %26, %28 : vector<60x256xf32>
    %cst_10 = arith.constant 0.000000e+00 : f32
    %30 = vector.broadcast %cst_10 : f32 to vector<60x256xf32>
    %31 = arith.maximumf %29, %30 : vector<60x256xf32>
    %c0_11 = arith.constant 0 : index
    %c0_12 = arith.constant 0 : index
    %32 = vector.load %arg6[%c0_11, %c0_12] : memref<3x60xbf16, #tpu.memory_space<vmem>>, vector<3x60xbf16>
    %33 = arith.truncf %31 : vector<60x256xf32> to vector<60x256xbf16>
    %cst_13 = arith.constant dense<0.000000e+00> : vector<3x256xf32>
    %34 = tpu.matmul %32, %33, %cst_13 {dimension_numbers = #tpu.dot_dimension_numbers<[1], [0], [0], [1], [0, 0, 1, 1], [], []>} : vector<3x60xbf16>, vector<60x256xbf16>, vector<3x256xf32> -> vector<3x256xf32>
    %c0_14 = arith.constant 0 : index
    %c0_15 = arith.constant 0 : index
    %35 = vector.load %arg7[%c0_14, %c0_15] : memref<3x1xf32, #tpu.memory_space<vmem>>, vector<3x1xf32>
    %36 = vector.broadcast %35 : vector<3x1xf32> to vector<3x256xf32>
    %37 = arith.addf %34, %36 : vector<3x256xf32>
    %c0_16 = arith.constant 0 : index
    %c0_17 = arith.constant 0 : index
    %38 = vector.load %arg8[%c0_16, %c0_17] : memref<3x256xf32, #tpu.memory_space<vmem>>, vector<3x256xf32>
    tpu.vector_store %arg8[%c0_16, %c0_17], %37 {strides = array<i32>} : memref<3x256xf32, #tpu.memory_space<vmem>>, vector<3x256xf32>,
    return
  }
  func.func @transform_0(%arg0: i32) -> (i32, i32) {
    %c0_i32 = arith.constant 0 : i32
    %c0_i32_0 = arith.constant 0 : i32
    return %c0_i32, %arg0 : i32, i32
  }
  func.func @transform_1(%arg0: i32) -> (i32, i32) {
    %c0_i32 = arith.constant 0 : i32
    %c0_i32_0 = arith.constant 0 : i32
    %c0_i32_1 = arith.constant 0 : i32
    return %c0_i32, %c0_i32_0 : i32, i32
  }
  func.func @transform_2(%arg0: i32) -> (i32, i32) {
    %c0_i32 = arith.constant 0 : i32
    %c0_i32_0 = arith.constant 0 : i32
    %c0_i32_1 = arith.constant 0 : i32
    return %c0_i32, %c0_i32_0 : i32, i32
  }
  func.func @transform_3(%arg0: i32) -> (i32, i32) {
    %c0_i32 = arith.constant 0 : i32
    %c0_i32_0 = arith.constant 0 : i32
    %c0_i32_1 = arith.constant 0 : i32
    return %c0_i32, %c0_i32_0 : i32, i32
  }
  func.func @transform_4(%arg0: i32) -> (i32, i32) {
    %c0_i32 = arith.constant 0 : i32
    %c0_i32_0 = arith.constant 0 : i32
    %c0_i32_1 = arith.constant 0 : i32
    return %c0_i32, %c0_i32_0 : i32, i32
  }
  func.func @transform_5(%arg0: i32) -> (i32, i32) {
    %c0_i32 = arith.constant 0 : i32
    %c0_i32_0 = arith.constant 0 : i32
    %c0_i32_1 = arith.constant 0 : i32
    return %c0_i32, %c0_i32_0 : i32, i32
  }
  func.func @transform_6(%arg0: i32) -> (i32, i32) {
    %c0_i32 = arith.constant 0 : i32
    %c0_i32_0 = arith.constant 0 : i32
    %c0_i32_1 = arith.constant 0 : i32
    return %c0_i32, %c0_i32_0 : i32, i32
  }
  func.func @transform_7(%arg0: i32) -> (i32, i32) {
    %c0_i32 = arith.constant 0 : i32
    %c0_i32_0 = arith.constant 0 : i32
    return %c0_i32, %arg0 : i32, i32
  }
}

</mosaic_0001>

<bundles_post_ra>
// kernel: autoencoder_forward.1
= control target key start
LH: loop header
LB: loop body
LE: loop exit
PB: predicated region body
PF: predicated region fallthrough
CT: control target
= control target key end

     0   :  { %s1033_s24 = smov 0   ;;  %s1253_s0 = inlined_call_operand.vmem [shape: f32[3,512], index: 0, kind: input, shape index: {}]   ;;  %s1254_s1 = inlined_call_operand.vmem [shape: f32[60,3], index: 1, kind: input, shape index: {}]   ;;  %s1255_s2 = inlined_call_operand.vmem [shape: f32[60,1], index: 2, kind: input, shape index: {}]   ;;  %s1256_s3 = inlined_call_operand.vmem [shape: bf16[60,60], index: 3, kind: input, shape index: {}]   ;;  %s1257_s4 = inlined_call_operand.vmem [shape: f32[60,1], index: 4, kind: input, shape index: {}]   ;;  %s1258_s5 = inlined_call_operand.vmem [shape: bf16[3,60], index: 5, kind: input, shape index: {}]   ;;  %s1259_s6 = inlined_call_operand.vmem [shape: f32[3,1], index: 6, kind: input, shape index: {}]   ;;  %s1260_s7 = inlined_call_operand.vmem [shape: f32[3,512], index: 7, kind: output, shape index: {}]  }
   0x1 LB: > { %s930_s25 = sadd.s32 4294967295, %s988_s24   ;;  %p934_p0 = scmp.ge.s32.totalorder %s988_s24, 1  ;;  %s988_s24 = sphi %s1033_s24, %s17_s24  }
   0x2   : > { %p238_p1 = scmp.lt.s32.totalorder %s988_s24, 3 }
   0x4   : > { %p239_p2 = pnand %p934_p0, %p238_p1 }
   0x5   : > { %v284_v0 = vld [vmem:[%s1254_s1] sm:$0xff] (!%p239_p2)  ;;  %v990_v1 = vmov (!%p239_p2), 2   ;;  %v991_v2 = vmov (!%p239_p2), 1   ;;  %v286_v3 = vld [vmem:[%s1254_s1 + $0x10] sm:$0xff] (!%p239_p2)  ;;  %v285_v4 = vld [vmem:[%s1254_s1 + $0x8] sm:$0xff] (!%p239_p2)  ;;  %v992_v5 = vmov (!%p239_p2), 0   ;;  %v333_v32 = vlaneseq (!%p239_p2) }
   0x6   : > { %242 = sbr.rel (%p239_p2) target bundleno = 699 (0x2bb), region = 48  ;;  %964 = vset.pattern.permute.xlu0 (!%p239_p2), %v990_v1  ;;  %963 = vset.pattern.permute.xlu1 (!%p239_p2), %v991_v2  ;;  %v289_v6 = vld [vmem:[%s1254_s1 + $0x28] sm:$0xff] (!%p239_p2)  ;;  %v288_v7 = vld [vmem:[%s1254_s1 + $0x20] sm:$0xff] (!%p239_p2)  ;;  %v291_v8 = vld [vmem:[%s1254_s1 + $0x38] sm:$0xf] (!%p239_p2)  ;;  %s935_s11 = sshll.u32 (!%p239_p2), %s930_s25, 1 }
   0x7   : > { %450 = vperm.xlu0 (!%p239_p2), %964, %v284_v0   ;;  %368 = vperm.xlu1 (!%p239_p2), %963, %v284_v0   ;;  %v287_v9 = vld [vmem:[%s1254_s1 + $0x18] sm:$0xff] (!%p239_p2)  ;;  %v531_v10 = vld [vmem:[%s1255_s2] sm:$0xff] (!%p239_p2)  ;;  %v532_v11 = vld [vmem:[%s1255_s2 + $0x8] sm:$0xff] (!%p239_p2)  ;;  %p271_p3 = scmp.lt.s32.totalorder (!%p239_p2), %s935_s11, 3  ;;  %v334_v35 = vshrl.u32 (!%p239_p2), %v333_v32, 7  ;;  %vm708_vm0 = vcmask (!%p239_p2), 1045504  }
   0x8   : > { %747 = vmatprep.mubr.bf16.mxu0 (!%p239_p2), %v992_v5  ;;  %860 = vmatprep.mubr.bf16.mxu1 (!%p239_p2), %v992_v5  ;;  %v290_v12 = vld [vmem:[%s1254_s1 + $0x30] sm:$0xff] (!%p239_p2)  ;;  %v535_v13 = vld [vmem:[%s1255_s2 + $0x20] sm:$0xff] (!%p239_p2)  ;;  %v538_v14 = vld [vmem:[%s1255_s2 + $0x38] sm:$0xf] (!%p239_p2)  ;;  %vm695_vm1 = vcmask (!%p239_p2), 490496  }
   0x9   : > { %v628_v15 = vld [vmem:[%s1257_s4 + $0x8] sm:$0xff] (!%p239_p2)  ;;  %v630_v16 = vld [vmem:[%s1257_s4 + $0x18] sm:$0xff] (!%p239_p2)  ;;  %v533_v17 = vld [vmem:[%s1255_s2 + $0x10] sm:$0xff] (!%p239_p2)  ;;  %v401_v37 = vsub.s32 (!%p239_p2), 1, %v334_v35  ;;  %v405_v38 = vsub.s32 (!%p239_p2), 5, %v334_v35  ;;  %v335_v39 = vsub.s32 (!%p239_p2), 0, %v334_v35 }
   0xa   : > { %v632_v18 = vld [vmem:[%s1257_s4 + $0x28] sm:$0xff] (!%p239_p2)  ;;  %v534_v19 = vld [vmem:[%s1255_s2 + $0x18] sm:$0xff] (!%p239_p2)  ;;  %v537_v22 = vld [vmem:[%s1255_s2 + $0x30] sm:$0xff] (!%p239_p2)  ;;  %v339_v40 = vsub.s32 (!%p239_p2), 4, %v334_v35  ;;  %v483_v43 = vsub.s32 (!%p239_p2), 2, %v334_v35  ;;  %v487_v44 = vsub.s32 (!%p239_p2), 6, %v334_v35 }
   0xb   : > { %458 = vperm.xlu0 (!%p239_p2), %964, %v286_v3   ;;  %372 = vperm.xlu1 (!%p239_p2), %963, %v285_v4   ;;  %v634_v20 = vld [vmem:[%s1257_s4 + $0x38] sm:$0xf] (!%p239_p2)  ;;  %v536_v21 = vld [vmem:[%s1255_s2 + $0x28] sm:$0xff] (!%p239_p2)  ;;  %v627_v23 = vld [vmem:[%s1257_s4] sm:$0xff] (!%p239_p2) }
   0xc   : > { %v629_v24 = vld [vmem:[%s1257_s4 + $0x10] sm:$0xff] (!%p239_p2)  ;;  %v631_v25 = vld [vmem:[%s1257_s4 + $0x20] sm:$0xff] (!%p239_p2) }
   0xd   : > { %v633_v26 = vld [vmem:[%s1257_s4 + $0x30] sm:$0xff]  ;;  %v813_v27 = vld [vmem:[%s1259_s6] sm:$0x7]  ;;  %s1262_s11 = smov (!%p271_p3, %s935_s11), 3 }
   0xe   : > { %s936_s12 = sshll.u32 %s1262_s11, 2 }
   0xf   : > { %470 = vperm.xlu0 %964, %v289_v6   ;;  %965 = vset.pattern.permute.xlu1 %v990_v1  ;;  %s274_s25 = scalar_lea.vmem %s1253_s0, %s936_s12  ;;  %s280_s29 = scalar_lea.vmem %s1260_s7, %s936_s12 }
  0x10   : > { %454 = vperm.xlu1 %965, %v285_v4   ;;  %v283_v42 = vld [vmem:[%s274_s25] sm:$0x77] }
  0x11   : > { %v402_v46 = vrot.slane %v283_v42, %v401_v37  ;;  %v406_v47 = vrot.slane %v283_v42, %v405_v38  ;;  %v336_v48 = vrot.slane %v283_v42, %v335_v39  ;;  %v340_v49 = vrot.slane %v283_v42, %v339_v40 }
  0x12   : > { %v484_v51 = vrot.slane %v283_v42, %v483_v43  ;;  %v488_v52 = vrot.slane %v283_v42, %v487_v44 }
  0x13   : > { %972 = vset.pattern.permute.xlu0 %v991_v2  ;;  %v1148_v53 = vrot.slane %v402_v46, %v401_v37  ;;  %v1150_v54 = vrot.slane %v406_v47, %v401_v37  ;;  %v1152_v55 = vrot.slane %v336_v48, %v335_v39  ;;  %v1154_v56 = vrot.slane %v340_v49, %v335_v39 }
  0x14   : > { %384 = vperm.xlu0 %972, %v288_v7   ;;  %966 = vset.pattern.permute.xlu1 %v992_v5  ;;  %v1160_v63 = vrot.slane %v484_v51, %v483_v43 }
  0x15   : > { %304 = vperm.xlu1 %966, %v286_v3  }
  0x18   : > { %396 = vperm.xlu0 %972, %v291_v8  }
  0x19   : > { %967 = vset.pattern.permute.xlu1 %v991_v2 }
  0x1a   : > { %376 = vperm.xlu1 %967, %v286_v3  }
  0x1c   : > { %975 = vset.pattern.permute.xlu0 %v992_v5 }
  0x1d   : > { %294 = vperm.xlu0 %975, %v284_v0   ;;  %v1162_v0 = vrot.slane %v488_v52, %v483_v43 }
  0x1e   : > { %380 = vperm.xlu1 %967, %v287_v9  }
  0x21   : > { %299 = vperm.xlu0 %975, %v285_v4  }
  0x22   : > { %968 = vset.pattern.permute.xlu1 %v990_v1 }
  0x23   : > { %462 = vperm.xlu1 %968, %v287_v9  }
  0x25   : > { %309 = vperm.xlu0 %975, %v287_v9  }
  0x27   : > { %969 = vset.pattern.permute.xlu1 %v992_v5 }
  0x28   : > { %541 = vperm.xlu1 %969, %v531_v10  }
  0x29   : > { %546 = vperm.xlu0 %975, %v532_v11  }
  0x2c   : > { %314 = vperm.xlu1 %969, %v288_v7  }
  0x2d   : > { %324 = vperm.xlu0 %975, %v290_v12  }
  0x30   : > { %319 = vperm.xlu1 %969, %v289_v6  }
  0x31   : > { %561 = vperm.xlu0 %975, %v535_v13  }
  0x34   : > { %970 = vset.pattern.permute.xlu1 %v991_v2 }
  0x35   : > { %388 = vperm.xlu1 %970, %v289_v6   ;;  %576 = vperm.xlu0 %975, %v538_v14  }
  0x39   : > { %971 = vset.pattern.permute.xlu1 %v990_v1  ;;  %642 = vperm.xlu0 %975, %v628_v15  }
  0x3a   : > { %466 = vperm.xlu1 %971, %v288_v7  }
  0x3d   : > { %652 = vperm.xlu0 %975, %v630_v16  }
  0x3e   : > { %973 = vset.pattern.permute.xlu1 %v992_v5 }
  0x3f   : > { %551 = vperm.xlu1 %973, %v533_v17  }
  0x41   : > { %662 = vperm.xlu0 %975, %v632_v18  }
  0x43   : > { %556 = vperm.xlu1 %973, %v534_v19  }
  0x45   : > { %672 = vperm.xlu0 %975, %v634_v20  }
  0x47   : > { %329 = vperm.xlu1 %973, %v291_v8  }
  0x4b   : > { %974 = vset.pattern.permute.xlu1 %v991_v2 }
  0x4c   : > { %392 = vperm.xlu1 %974, %v290_v12  }
  0x50   : > { %976 = vset.pattern.permute.xlu1 %v990_v1 }
  0x51   : > { %474 = vperm.xlu1 %976, %v290_v12  }
  0x55   : > { %478 = vperm.xlu1 %976, %v291_v8  }
  0x59   : > { %977 = vset.pattern.permute.xlu1 %v992_v5 }
  0x5a   : > { %566 = vperm.xlu1 %977, %v536_v21  }
  0x5e   : > { %571 = vperm.xlu1 %977, %v537_v22  }
  0x62   : > { %637 = vperm.xlu1 %977, %v627_v23  }
  0x66   : > { %647 = vperm.xlu1 %977, %v629_v24  }
  0x6a   : > { %657 = vperm.xlu1 %977, %v631_v25  }
  0x6e   : > { %667 = vperm.xlu1 %977, %v633_v26  }
  0x72   : > { %816 = vperm.xlu1 %977, %v813_v27  }
  0x86   : > { %v369_v28 = vpop.permute.xlu1 %368  ;;  %v451_v29 = vpop.permute.xlu0 %450 }
  0x87   : > { %v417_v61 = vmul.f32 %v1148_v53, %v369_v28  ;;  %v418_v62 = vmul.f32 %v1150_v54, %v369_v28  ;;  %v499_v7 = vmul.f32 %v1160_v63, %v451_v29  ;;  %v500_v8 = vmul.f32 %v1162_v0, %v451_v29 }
  0x8a   : > { %v373_v30 = vpop.permute.xlu1 %372  ;;  %v1130_v31 = vpop.permute.xlu0 %458 }
  0x8b   : > { %v419_v2 = vmul.f32 %v1148_v53, %v373_v30  ;;  %v420_v3 = vmul.f32 %v1150_v54, %v373_v30  ;;  %v503_v48 = vmul.f32 %v1160_v63, %v1130_v31  ;;  %v504_v49 = vmul.f32 %v1162_v0, %v1130_v31 }
  0x8e   : > { %v1134_v33 = vpop.permute.xlu0 %470 }
  0x8f   : > { %v455_v34 = vpop.permute.xlu1 %454 }
  0x90   : > { %v501_v15 = vmul.f32 %v1160_v63, %v455_v34  ;;  %v502_v16 = vmul.f32 %v1162_v0, %v455_v34 }
  0x93   : > { %v1142_v36 = vpop.permute.xlu0 %384 }
  0x94   : > { %v1144_v41 = vpop.permute.xlu1 %304 }
  0x95   : > { %v355_v42 = vmul.f32 %v1152_v55, %v1144_v41  ;;  %v356_v43 = vmul.f32 %v1154_v56, %v1144_v41 }
  0x97   : > { %v1146_v45 = vpop.permute.xlu0 %396 }
  0x99   : > { %v377_v50 = vpop.permute.xlu1 %376 }
  0x9a   : > { %v421_v39 = vmul.f32 %v1148_v53, %v377_v50  ;;  %v422_v40 = vmul.f32 %v1150_v54, %v377_v50 }
  0x9c   : > { %v295_v57 = vpop.permute.xlu0 %294  ;;  %v437_v51 = vadd.f32 %v421_v39, %v355_v42  ;;  %v438_v52 = vadd.f32 %v422_v40, %v356_v43  ;;  %v432_v42 = vmul.f32 %v1150_v54, %v1146_v45 }
  0x9d   : > { %v381_v58 = vpop.permute.xlu1 %380  ;;  %v351_v59 = vmul.f32 %v1152_v55, %v295_v57  ;;  %v352_v60 = vmul.f32 %v1154_v56, %v295_v57 }
  0x9e   : > { %v423_v50 = vmul.f32 %v1148_v53, %v381_v58  ;;  %v424_v57 = vmul.f32 %v1150_v54, %v381_v58 }
  0x9f   : > { %v433_v9 = vadd.f32 %v417_v61, %v351_v59  ;;  %v434_v10 = vadd.f32 %v418_v62, %v352_v60 }
  0xa0   : > { %v300_v1 = vpop.permute.xlu0 %299 }
  0xa1   : > { %v353_v4 = vmul.f32 %v1152_v55, %v300_v1  ;;  %v354_v6 = vmul.f32 %v1154_v56, %v300_v1  ;;  %v515_v17 = vadd.f32 %v499_v7, %v433_v9  ;;  %v516_v18 = vadd.f32 %v500_v8, %v434_v10 }
  0xa2   : > { %v463_v11 = vpop.permute.xlu1 %462  ;;  %v519_v1 = vadd.f32 %v503_v48, %v437_v51 }
  0xa3   : > { %v435_v12 = vadd.f32 %v419_v2, %v353_v4  ;;  %v436_v13 = vadd.f32 %v420_v3, %v354_v6  ;;  %v505_v61 = vmul.f32 %v1160_v63, %v463_v11  ;;  %v506_v62 = vmul.f32 %v1162_v0, %v463_v11 }
  0xa4   : > { %v310_v14 = vpop.permute.xlu0 %309  ;;  %v520_v2 = vadd.f32 %v504_v49, %v438_v52  ;;  %v425_v11 = vmul.f32 %v1148_v53, %v1142_v36 }
  0xa5   : > { %v517_v20 = vadd.f32 %v501_v15, %v435_v12  ;;  %v518_v21 = vadd.f32 %v502_v16, %v436_v13  ;;  %v357_v44 = vmul.f32 %v1152_v55, %v310_v14  ;;  %v358_v46 = vmul.f32 %v1154_v56, %v310_v14 }
  0xa7   : > { %v542_v19 = vpop.permute.xlu1 %541  ;;  %v439_v59 = vadd.f32 %v423_v50, %v357_v44  ;;  %v440_v60 = vadd.f32 %v424_v57, %v358_v46 }
  0xa8   : > { %v579_v22 = vadd.f32 %v542_v19, %v515_v17  ;;  %v580_v23 = vadd.f32 %v542_v19, %v516_v18  ;;  %v547_v24 = vpop.permute.xlu0 %546  ;;  %v426_v18 = vmul.f32 %v1150_v54, %v1142_v36 }
  0xa9   : > { %v581_v25 = vadd.f32 %v547_v24, %v517_v20  ;;  %v582_v26 = vadd.f32 %v547_v24, %v518_v21  ;;  %v521_v6 = vadd.f32 %v505_v61, %v439_v59  ;;  %v522_v7 = vadd.f32 %v506_v62, %v440_v60 }
  0xaa   : > { %v595_v27 = vmax.f32 %v579_v22, 0.0  ;;  %v596_v28 = vmax.f32 %v580_v23, 0.0 }
  0xab   : > { %v597_v29 = vmax.f32 %v581_v25, 0.0  ;;  %v315_v30 = vpop.permute.xlu1 %314  ;;  %v598_v32 = vmax.f32 %v582_v26, 0.0 }
  0xac   : > { %v359_v19 = vmul.f32 %v1152_v55, %v315_v30  ;;  %v360_v20 = vmul.f32 %v1154_v56, %v315_v30  ;;  %v325_v21 = vpop.permute.xlu0 %324 }
  0xad   : > { %v620_v35 = vpack.c.bf16 %v598_v32, %v596_v28  ;;  %v619_v37 = vpack.c.bf16 %v597_v29, %v595_v27  ;;  %v363_v51 = vmul.f32 %v1152_v55, %v325_v21  ;;  %v364_v52 = vmul.f32 %v1154_v56, %v325_v21 }
  0xae   : > { %v441_v27 = vadd.f32 %v425_v11, %v359_v19  ;;  %v442_v28 = vadd.f32 %v426_v18, %v360_v20 }
  0xaf   : > { %v320_v38 = vpop.permute.xlu1 %319  ;;  %715 = vmatprep.subr.bf16.mxu0 %v620_v35  ;;  %v509_v35 = vmul.f32 %v1160_v63, %v1134_v33 }
  0xb0   : > { %716 = vmatpush1.bf16.msra.mxu0 %v619_v37  ;;  %v361_v29 = vmul.f32 %v1152_v55, %v320_v38  ;;  %v362_v36 = vmul.f32 %v1154_v56, %v320_v38  ;;  %v510_v37 = vmul.f32 %v1162_v0, %v1134_v33  ;;  %v562_v46 = vpop.permute.xlu0 %561 }
  0xb4   : > { %v389_v34 = vpop.permute.xlu1 %388 }
  0xb5   : > { %v427_v24 = vmul.f32 %v1148_v53, %v389_v34  ;;  %v428_v25 = vmul.f32 %v1150_v54, %v389_v34  ;;  %v431_v34 = vmul.f32 %v1148_v53, %v1146_v45 }
  0xb7   : > { %v443_v43 = vadd.f32 %v427_v24, %v361_v29  ;;  %v444_v38 = vadd.f32 %v428_v25, %v362_v36  ;;  %v980_v24 = vld [vmem:[%s1256_s3 + $0x10] sm:$0xff]   ;;  %v981_v25 = vld [vmem:[%s1256_s3 + $0x18] sm:$0x3f]  }
  0xb9   : > { %v467_v47 = vpop.permute.xlu1 %466  ;;  %v525_v62 = vadd.f32 %v509_v35, %v443_v43 }
  0xba   : > { %v507_v22 = vmul.f32 %v1160_v63, %v467_v47  ;;  %v508_v23 = vmul.f32 %v1162_v0, %v467_v47 }
  0xbc   : > { %v523_v39 = vadd.f32 %v507_v22, %v441_v27  ;;  %v524_v40 = vadd.f32 %v508_v23, %v442_v28  ;;  %v978_v22 = vld [vmem:[%s1256_s3] sm:$0xff]   ;;  %v979_v23 = vld [vmem:[%s1256_s3 + $0x8] sm:$0xff]  }
  0xbe   : > { %v552_v41 = vpop.permute.xlu1 %551  ;;  %v587_v59 = vadd.f32 %v562_v46, %v523_v39  ;;  %v588_v45 = vadd.f32 %v562_v46, %v524_v40 }
  0xbf   : > { %v583_v3 = vadd.f32 %v552_v41, %v519_v1  ;;  %v584_v4 = vadd.f32 %v552_v41, %v520_v2 }
  0xc1   : > { %v599_v10 = vmax.f32 %v583_v3, 0.0  ;;  %v600_v12 = vmax.f32 %v584_v4, 0.0 }
  0xc2   : > { %v557_v31 = vpop.permute.xlu1 %556 }
  0xc3   : > { %v585_v8 = vadd.f32 %v557_v31, %v521_v6  ;;  %v586_v9 = vadd.f32 %v557_v31, %v522_v7  ;;  %v604_v31 = vmax.f32 %v588_v45, 0.0 }
  0xc5   : > { %v601_v13 = vmax.f32 %v585_v8, 0.0  ;;  %v602_v58 = vmax.f32 %v586_v9, 0.0  ;;  %v603_v8 = vmax.f32 %v587_v59, 0.0 }
  0xc6   : > { %v330_v14 = vpop.permute.xlu1 %329 }
  0xc7   : > { %v622_v15 = vpack.c.bf16 %v602_v58, %v600_v12  ;;  %v621_v16 = vpack.c.bf16 %v601_v13, %v599_v10  ;;  %v365_v32 = vmul.f32 %v1152_v55, %v330_v14  ;;  %v366_v30 = vmul.f32 %v1154_v56, %v330_v14  ;;  %v577_v55 = vpop.permute.xlu0 %576 }
  0xc9   : > { %717 = vmatprep.subr.bf16.mxu0 %v622_v15  ;;  %v447_v50 = vadd.f32 %v431_v34, %v365_v32  ;;  %v448_v57 = vadd.f32 %v432_v42, %v366_v30 }
  0xca   : > { %718 = vmatpush1.bf16.msra.mxu0 %v621_v16 }
  0xcb   : > { %v393_v17 = vpop.permute.xlu1 %392  ;;  %v643_v36 = vpop.permute.xlu0 %642 }
  0xcc   : > { %v429_v47 = vmul.f32 %v1148_v53, %v393_v17  ;;  %v430_v48 = vmul.f32 %v1150_v54, %v393_v17  ;;  %v526_v54 = vadd.f32 %v510_v37, %v444_v38 }
  0xce   : > { %v445_v1 = vadd.f32 %v429_v47, %v363_v51  ;;  %v446_v2 = vadd.f32 %v430_v48, %v364_v52 }
  0xd0   : > { %v475_v26 = vpop.permute.xlu1 %474 }
  0xd1   : > { %v511_v60 = vmul.f32 %v1160_v63, %v475_v26  ;;  %v512_v41 = vmul.f32 %v1162_v0, %v475_v26 }
  0xd3   : > { %v527_v7 = vadd.f32 %v511_v60, %v445_v1  ;;  %v528_v56 = vadd.f32 %v512_v41, %v446_v2 }
  0xd4   : > { %v479_v44 = vpop.permute.xlu1 %478 }
  0xd5   : > { %v513_v49 = vmul.f32 %v1160_v63, %v479_v44  ;;  %v514_v33 = vmul.f32 %v1162_v0, %v479_v44 }
  0xd7   : > { %v529_v61 = vadd.f32 %v513_v49, %v447_v50  ;;  %v530_v53 = vadd.f32 %v514_v33, %v448_v57  ;;  %v653_v49 = vpop.permute.xlu0 %652 }
  0xd9   : > { %v567_v3 = vpop.permute.xlu1 %566  ;;  %v593_v9 = vadd.f32 %v577_v55, %v529_v61  ;;  %v594_v10 = vadd.f32 %v577_v55, %v530_v53 }
  0xda   : > { %v589_v4 = vadd.f32 %v567_v3, %v525_v62  ;;  %v590_v6 = vadd.f32 %v567_v3, %v526_v54 }
  0xdb   : > { %v610_v11 = vmax.f32 %v594_v10, 0.0  ;;  %v609_v18 = vmax.f32 %v593_v9, 0.0  ;;  %v663_v3 = vpop.permute.xlu0 %662 }
  0xdc   : > { %v605_v12 = vmax.f32 %v589_v4, 0.0  ;;  %v606_v63 = vmax.f32 %v590_v6, 0.0 }
  0xdd   : > { %v572_v13 = vpop.permute.xlu1 %571 }
  0xde   : > { %v591_v0 = vadd.f32 %v572_v13, %v527_v7  ;;  %v592_v58 = vadd.f32 %v572_v13, %v528_v56  ;;  %v624_v14 = vpack.c.bf16 %v606_v63, %v604_v31  ;;  %v623_v15 = vpack.c.bf16 %v605_v12, %v603_v8 }
  0xe0   : > { %v607_v16 = vmax.f32 %v591_v0, 0.0  ;;  %v608_v17 = vmax.f32 %v592_v58, 0.0  ;;  %719 = vmatprep.subr.bf16.mxu0 %v624_v14 }
  0xe1   : > { %720 = vmatpush1.bf16.msra.mxu0 %v623_v15  ;;  %v638_v26 = vpop.permute.xlu1 %637  ;;  %v673_v15 = vpop.permute.xlu0 %672 }
  0xe2   : > { %v626_v19 = vpack.c.bf16 %v610_v11, %v608_v17  ;;  %v625_v20 = vpack.c.bf16 %v609_v18, %v607_v16 }
  0xe4   : > { %943 = vmatprep.subr.msk.bf16.mxu0 %vm708_vm0, %v626_v19  ;;  %v710_v21 = vsel %vm708_vm0, %v625_v20, 0 }
  0xe5   : > { %722 = vmatpush1.bf16.msra.mxu0 %v710_v21  ;;  %v648_v38 = vpop.permute.xlu1 %647 }
  0xe8   : > { %944 = vmatmul.mubr.msk.bf16.vlgmr.msra.gmra.mrb[0].mxu0 %vm695_vm1, %v978_v22 }
  0xe9   : > { %757 = vmatprep.mubr.bf16.mxu0 %v992_v5  ;;  %v658_v53 = vpop.permute.xlu1 %657 }
  0xed   : > { %v668_v63 = vpop.permute.xlu1 %667 }
  0xf0   : > { %945 = vmatmul.mubr.msk.bf16.gmra.mrb[4].mxu0 %vm695_vm1, %v979_v23 }
  0xf1   : > { %767 = vmatprep.mubr.bf16.mxu0 %v992_v5 }
  0xf8   : > { %946 = vmatmul.mubr.msk.bf16.gmra.mrb[8].mxu0 %vm695_vm1, %v980_v24 }
  0xf9   : > { %777 = vmatprep.mubr.bf16.mxu0 %v992_v5 }
 0x100   : > { %947 = vmatmul.mubr.msk.bf16.gmra.mrb[12].mxu0 %vm695_vm1, %v981_v25 }
 0x1bb   : > { %v749_v27 = vpop.f32.mrb[0].mxu0 }
 0x1bc   : > { %v750_v28 = vadd.f32 %v749_v27, %v638_v26  ;;  %v751_v29 = vpop.f32.mrb[1].mxu0  ;;  %v804_v27 = vld [vmem:[%s1258_s5] sm:$0x3] }
 0x1bd   : > { %v752_v32 = vadd.f32 %v751_v29, %v638_v26  ;;  %v753_v30 = vpop.f32.mrb[2].mxu0 }
 0x1be   : > { %v754_v35 = vadd.f32 %v753_v30, %v643_v36  ;;  %v755_v37 = vpop.f32.mrb[3].mxu0  ;;  %v788_v40 = vmax.f32 %v750_v28, 0.0  ;;  %v817_v28 = vpop.permute.xlu1 %816 }
 0x1bf   : > { %v756_v39 = vadd.f32 %v755_v37, %v643_v36  ;;  %v789_v42 = vmax.f32 %v752_v32, 0.0 }
 0x1c0   : > { %v790_v34 = vmax.f32 %v754_v35, 0.0 }
 0x1c1   : > { %v791_v5 = vmax.f32 %v756_v39, 0.0 }
 0x1c2   : > { %v805_v43 = vpack.c.bf16 %v790_v34, %v788_v40 }
 0x1c3   : > { %v759_v44 = vpop.f32.mrb[4].mxu0  ;;  %v806_v46 = vpack.c.bf16 %v791_v5, %v789_v42 }
 0x1c4   : > { %v760_v47 = vadd.f32 %v759_v44, %v648_v38  ;;  %v761_v48 = vpop.f32.mrb[5].mxu0 }
 0x1c5   : > { %v762_v33 = vadd.f32 %v761_v48, %v648_v38  ;;  %v763_v51 = vpop.f32.mrb[6].mxu0  ;;  %828 = vmatprep.subr.bf16.mxu1 %v806_v46 }
 0x1c6   : > { %v764_v52 = vadd.f32 %v763_v51, %v653_v49  ;;  %v765_v50 = vpop.f32.mrb[7].mxu0  ;;  %829 = vmatpush1.bf16.msra.mxu1 %v805_v43  ;;  %v792_v59 = vmax.f32 %v760_v47, 0.0 }
 0x1c7   : > { %v766_v57 = vadd.f32 %v765_v50, %v653_v49  ;;  %v793_v60 = vmax.f32 %v762_v33, 0.0 }
 0x1c8   : > { %v794_v45 = vmax.f32 %v764_v52, 0.0 }
 0x1c9   : > { %v795_v41 = vmax.f32 %v766_v57, 0.0 }
 0x1ca   : > { %v807_v61 = vpack.c.bf16 %v794_v45, %v792_v59 }
 0x1cb   : > { %v808_v62 = vpack.c.bf16 %v795_v41, %v793_v60  ;;  %v769_v54 = vpop.f32.mrb[8].mxu0 }
 0x1cc   : > { %v770_v1 = vadd.f32 %v769_v54, %v658_v53  ;;  %v771_v2 = vpop.f32.mrb[9].mxu0 }
 0x1cd   : > { %v772_v4 = vadd.f32 %v771_v2, %v658_v53  ;;  %v773_v6 = vpop.f32.mrb[10].mxu0  ;;  %830 = vmatprep.subr.bf16.mxu1 %v808_v62 }
 0x1ce   : > { %v774_v55 = vadd.f32 %v773_v6, %v663_v3  ;;  %v775_v7 = vpop.f32.mrb[11].mxu0  ;;  %831 = vmatpush1.bf16.msra.mxu1 %v807_v61  ;;  %v796_v31 = vmax.f32 %v770_v1, 0.0 }
 0x1cf   : > { %v776_v56 = vadd.f32 %v775_v7, %v663_v3  ;;  %v797_v9 = vmax.f32 %v772_v4, 0.0 }
 0x1d0   : > { %v798_v8 = vmax.f32 %v774_v55, 0.0 }
 0x1d1   : > { %v799_v10 = vmax.f32 %v776_v56, 0.0 }
 0x1d2   : > { %v809_v12 = vpack.c.bf16 %v798_v8, %v796_v31 }
 0x1d3   : > { %v810_v13 = vpack.c.bf16 %v799_v10, %v797_v9  ;;  %v779_v0 = vpop.f32.mrb[12].mxu0 }
 0x1d4   : > { %v780_v58 = vadd.f32 %v779_v0, %v668_v63  ;;  %v781_v14 = vpop.f32.mrb[13].mxu0 }
 0x1d5   : > { %v782_v16 = vadd.f32 %v781_v14, %v668_v63  ;;  %v783_v17 = vpop.f32.mrb[14].mxu0  ;;  %832 = vmatprep.subr.bf16.mxu1 %v810_v13 }
 0x1d6   : > { %v784_v11 = vadd.f32 %v783_v17, %v673_v15  ;;  %v785_v18 = vpop.f32.mrb[15].mxu0  ;;  %833 = vmatpush1.bf16.msra.mxu1 %v809_v12  ;;  %v800_v20 = vmax.f32 %v780_v58, 0.0 }
 0x1d7   : > { %v786_v19 = vadd.f32 %v785_v18, %v673_v15  ;;  %v801_v22 = vmax.f32 %v782_v16, 0.0 }
 0x1d8   : > { %v802_v21 = vmax.f32 %v784_v11, 0.0 }
 0x1d9   : > { %v803_v23 = vmax.f32 %v786_v19, 0.0 }
 0x1da   : > { %v811_v24 = vpack.c.bf16 %v802_v21, %v800_v20 }
 0x1db   : > { %v812_v25 = vpack.c.bf16 %v803_v23, %v801_v22 }
 0x1dc   : > { %v823_v26 = vsel %vm708_vm0, %v811_v24, 0 }
 0x1dd   : > { %948 = vmatprep.subr.msk.bf16.mxu1 %vm708_vm0, %v812_v25 }
 0x1de   : > { %835 = vmatpush1.bf16.msra.mxu1 %v823_v26 }
 0x1e1   : > { %949 = vmatmul.mubr.msk.bf16.vlgmr.msra.gmra.mrb[0].mxu1 %vm695_vm1, %v804_v27 }
 0x2b4   : > { %v862_v29 = vpop.f32.mrb[0].mxu1 }
 0x2b5   : > { %v863_v36 = vadd.f32 %v862_v29, %v817_v28  ;;  %v864_v32 = vpop.f32.mrb[1].mxu1 }
 0x2b6   : > { %v865_v30 = vadd.f32 %v864_v32, %v817_v28  ;;  %v866_v35 = vpop.f32.mrb[2].mxu1 }
 0x2b7   : > { %v867_v37 = vpop.f32.mrb[3].mxu1 }
 0x2b8   : > { %v871_v39 = vcombine.low %v863_v36, %v865_v30 }
 0x2ba   : > { %873 = vst [vmem:[%s280_s29] sm:$0x77] %v871_v39 }
 0x2bb PF: > { %s17_s24 = sadd.s32 1, %s988_s24  }
 0x2bc   : > { %p14_p4 = scmp.ge.s32.totalorder %s17_s24, 4  }
 0x2be   :  { %16 = sbr.rel (!%p14_p4) target bundleno = 1 (0x1), region = 78 }

</bundles_post_ra>
